<compile_context>
chip_gen: v5e
topology: v5e:2x2
jax: 0.10.0
libtpu: 0.0.40
codegen_flags: <defaults>
</compile_context>

<pallas_src>
import jax
import jax.numpy as jnp
from jax.experimental import pallas as pl
from jax.experimental.pallas import tpu as pltpu

MATMUL_DTYPE = jnp.bfloat16   # MXU input dtype; accumulation stays f32
LANE = 128
SUBLANE = 8
KGRAN = 16                    # bf16 sublane-packing granule for contraction dims
VMEM_LIMIT = 48 * 1024 * 1024  # safe on v7x (64 MiB physical) and v5e/v6e


def _round_up(x, m):
    return (x + m - 1) // m * m


def _sigmoid(z):
    # tanh identity: one EUP transcendental instead of exp + reciprocal.
    return 0.5 * (jnp.tanh(0.5 * z) + 1.0)


# ----------------------------- Pallas kernels ------------------------------

def _conv_sigmoid_kernel(p_ref, w_ref, o_ref):
    """Conv as a single lane-dense matmul + sigmoid.

    p_ref : [Kpad, TN] bf16 -- im2col patches (bias row of ones included),
                               lanes = raveled (b, oh, ow) output pixels
    w_ref : [OCp, Kpad] bf16 -- flattened conv weight, bias folded in col CKK
    o_ref : [OCp, TN]   bf16 -- sigmoid(conv) activations, lane-dense
    """
    z = jnp.dot(w_ref[...], p_ref[...], preferred_element_type=jnp.float32)
    o_ref[...] = _sigmoid(z).astype(o_ref.dtype)


def _tail_kernel(x_ref, w3_ref, b3_ref, w1_ref, b1_ref, w2_ref, b2_ref,
                 logits_ref, probs_ref):
    """Fused conv3 (pure matmul) + fc1 + sigmoid + fc2 + softmax.

    x_ref : [TB, K3p] bf16 (flattened pool2 output, (c, ki, kj) ordering)
    w3    : [K3p, 128] bf16,  b3: [1, 128] f32
    w1    : [128, 128] bf16,  b1: [1, 128] f32
    w2    : [128, 128] bf16,  b2: [1, 128] f32 (padded classes get -1e30 bias)
    """
    h = jnp.dot(x_ref[...], w3_ref[...],
                preferred_element_type=jnp.float32) + b3_ref[...]      # conv3
    h = jnp.dot(h.astype(MATMUL_DTYPE), w1_ref[...],
                preferred_element_type=jnp.float32) + b1_ref[...]      # fc1
    h = _sigmoid(h)                                                    # sigmoid
    z = jnp.dot(h.astype(MATMUL_DTYPE), w2_ref[...],
                preferred_element_type=jnp.float32) + b2_ref[...]      # fc2
    logits_ref[...] = z
    m = jnp.max(z, axis=-1, keepdims=True)
    e = jnp.exp(z - m)
    # Exact divide so probs sum to 1 within f32 rounding (fixes prior assert).
    probs_ref[...] = e / jnp.sum(e, axis=-1, keepdims=True)


# ----------------------------- Pallas wrappers ------------------------------

def conv_sigmoid_pool(x_cm, weight, bias, *, block_cols=2048):
    """Channel-major conv (stride 1, valid) + sigmoid + 2x2 avg-pool.

    x_cm   : [C, B, H, W] bf16 (channel-major activations)
    weight : [OC, C, K, K] f32, bias: [OC] f32
    returns: [OC, B, (H-K+1)//2, (W-K+1)//2] bf16, channel-major
    """
    C, B, H, W = x_cm.shape
    OC, _, K, _ = weight.shape
    OH, OW = H - K + 1, W - K + 1
    PH, PW = OH // 2, OW // 2
    CKK = C * K * K
    M = B * OH * OW

    # im2col without transposes: channel-major strided slices stacked on a new
    # axis then collapsed row-major -> rows ordered (c, ki, kj), lanes (b,oh,ow).
    cols = [x_cm[:, :, ki:ki + OH, kj:kj + OW]
            for ki in range(K) for kj in range(K)]             # each [C,B,OH,OW]
    patches = jnp.stack(cols, axis=1).reshape(CKK, M)          # [CKK, M] bf16

    Kpad = _round_up(CKK + 1, KGRAN)          # +1 row of ones for the bias fold
    TN = min(block_cols, _round_up(M, LANE))  # lane-dense column tile
    Mpad = _round_up(M, TN)
    OCp = _round_up(OC, SUBLANE)

    patches = jnp.concatenate(
        [patches, jnp.ones((1, M), MATMUL_DTYPE)], axis=0)     # bias row = 1.0
    patches = jnp.pad(patches, ((0, Kpad - CKK - 1), (0, Mpad - M)))

    w = jnp.zeros((OCp, Kpad), jnp.float32)
    w = w.at[:OC, :CKK].set(weight.reshape(OC, CKK))
    w = w.at[:OC, CKK].set(bias)                               # bias column
    w = w.astype(MATMUL_DTYPE)

    out = pl.pallas_call(
        _conv_sigmoid_kernel,
        out_shape=jax.ShapeDtypeStruct((OCp, Mpad), MATMUL_DTYPE),
        grid_spec=pltpu.PrefetchScalarGridSpec(
            num_scalar_prefetch=0,
            grid=(Mpad // TN,),
            in_specs=[
                pl.BlockSpec((Kpad, TN), lambda i: (0, i)),
                pl.BlockSpec((OCp, Kpad), lambda i: (0, 0)),
            ],
            out_specs=pl.BlockSpec((OCp, TN), lambda i: (0, i)),
        ),
        compiler_params=pltpu.CompilerParams(
            dimension_semantics=("parallel",),
            vmem_limit_bytes=VMEM_LIMIT,
        ),
    )(patches, w)

    # 2x2 average pool on the (small) activation-sized tensor, stays bf16.
    y = out[:OC, :M].reshape(OC, B, PH, 2, PW, 2)
    y = jnp.mean(y.astype(jnp.float32), axis=(3, 5)).astype(MATMUL_DTYPE)
    return y                                                   # [OC, B, PH, PW]


def tail_fused(x3, conv3_w, conv3_b, fc1_w, fc1_b, fc2_w, fc2_b,
               *, block_rows=256):
    """Fused conv3 + fc1 + sigmoid + fc2 + softmax, gridded over batch rows.

    x3: [B, 16*5*5] bf16 (flattened pool2 output, (c, ki, kj) ordering)
    conv3_w: [120, 16, 5, 5]; fc1_w: [84, 120]; fc2_w: [n_classes, 84]
    returns (logits [B, n_classes] f32, probs [B, n_classes] f32)
    """
    B, K3 = x3.shape
    OC3 = conv3_w.shape[0]          # 120
    H1 = fc1_w.shape[0]             # 84
    NC = fc2_w.shape[0]             # n_classes

    K3p = _round_up(K3, KGRAN)
    OC3p = _round_up(OC3, LANE)
    H1p = _round_up(H1, LANE)
    NCp = _round_up(NC, LANE)
    TB = min(block_rows, _round_up(B, SUBLANE))
    Bpad = _round_up(B, TB)

    x3p = jnp.pad(x3.astype(MATMUL_DTYPE), ((0, Bpad - B), (0, K3p - K3)))
    w3p = jnp.pad(conv3_w.reshape(OC3, K3).T,
                  ((0, K3p - K3), (0, OC3p - OC3))).astype(MATMUL_DTYPE)
    b3p = jnp.pad(conv3_b.astype(jnp.float32),
                  (0, OC3p - OC3)).reshape(1, OC3p)
    w1p = jnp.pad(fc1_w.T,
                  ((0, OC3p - OC3), (0, H1p - H1))).astype(MATMUL_DTYPE)
    b1p = jnp.pad(fc1_b.astype(jnp.float32), (0, H1p - H1)).reshape(1, H1p)
    w2p = jnp.pad(fc2_w.T,
                  ((0, H1p - H1), (0, NCp - NC))).astype(MATMUL_DTYPE)
    # Padded class columns get a huge negative bias so softmax ignores them.
    b2p = jnp.full((1, NCp), -1e30, jnp.float32).at[0, :NC].set(
        fc2_b.astype(jnp.float32))

    logits, probs = pl.pallas_call(
        _tail_kernel,
        out_shape=(jax.ShapeDtypeStruct((Bpad, NCp), jnp.float32),
                   jax.ShapeDtypeStruct((Bpad, NCp), jnp.float32)),
        grid_spec=pltpu.PrefetchScalarGridSpec(
            num_scalar_prefetch=0,
            grid=(Bpad // TB,),
            in_specs=[
                pl.BlockSpec((TB, K3p), lambda i: (i, 0)),
                pl.BlockSpec((K3p, OC3p), lambda i: (0, 0)),
                pl.BlockSpec((1, OC3p), lambda i: (0, 0)),
                pl.BlockSpec((OC3p, H1p), lambda i: (0, 0)),
                pl.BlockSpec((1, H1p), lambda i: (0, 0)),
                pl.BlockSpec((H1p, NCp), lambda i: (0, 0)),
                pl.BlockSpec((1, NCp), lambda i: (0, 0)),
            ],
            out_specs=(pl.BlockSpec((TB, NCp), lambda i: (i, 0)),
                       pl.BlockSpec((TB, NCp), lambda i: (i, 0))),
        ),
        compiler_params=pltpu.CompilerParams(
            dimension_semantics=("parallel",),
            vmem_limit_bytes=VMEM_LIMIT,
        ),
    )(x3p, w3p, b3p, w1p, b1p, w2p, b2p)
    return logits[:B, :NC], probs[:B, :NC]


# ------------------------------- LeNet5 model -------------------------------

def init_params(key, n_classes):
    ks = jax.random.split(key, 10)

    def uniform(k, shape, fan_in):
        bound = 1.0 / jnp.sqrt(jnp.float32(fan_in))
        return jax.random.uniform(k, shape, jnp.float32, -bound, bound)

    return {
        "conv1_w": uniform(ks[0], (6, 3, 5, 5), 3 * 25),
        "conv1_b": uniform(ks[1], (6,), 3 * 25),
        "conv2_w": uniform(ks[2], (16, 6, 5, 5), 6 * 25),
        "conv2_b": uniform(ks[3], (16,), 6 * 25),
        "conv3_w": uniform(ks[4], (120, 16, 5, 5), 16 * 25),
        "conv3_b": uniform(ks[5], (120,), 16 * 25),
        "fc1_w": uniform(ks[6], (84, 120), 120),   # PyTorch Linear: [out, in]
        "fc1_b": uniform(ks[7], (84,), 120),
        "fc2_w": uniform(ks[8], (n_classes, 84), 84),
        "fc2_b": uniform(ks[9], (n_classes,), 84),
    }


def lenet5_forward(params, x):
    """x: [B, 3, 32, 32] f32 (NCHW) -> (logits [B, n_classes], probs)."""
    # One-time NCHW -> channel-major + early bf16 cast; all conv layers then
    # stay channel-major (no inter-layer NCHW round-trips).
    xc = x.transpose(1, 0, 2, 3).astype(MATMUL_DTYPE)                # [3,B,32,32]
    xc = conv_sigmoid_pool(xc, params["conv1_w"], params["conv1_b"])  # [6,B,14,14]
    xc = conv_sigmoid_pool(xc, params["conv2_w"], params["conv2_b"])  # [16,B,5,5]
    B = xc.shape[1]
    x3 = xc.transpose(1, 0, 2, 3).reshape(B, 16 * 5 * 5)   # tiny (c,ki,kj) flat
    logits, probs = tail_fused(x3, params["conv3_w"], params["conv3_b"],
                               params["fc1_w"], params["fc1_b"],
                               params["fc2_w"], params["fc2_b"])
    return logits, probs


# ---------------------------------- main -------------------------------------

if __name__ == "__main__":
    n_classes = 10
    batch = 2

    key = jax.random.PRNGKey(0)
    k_params, k_input = jax.random.split(key)
    params = init_params(k_params, n_classes)
    x = jax.random.normal(k_input, (batch, 3, 32, 32), jnp.float32)

    logits, probs = jax.jit(lenet5_forward)(params, x)
    jax.block_until_ready((logits, probs))

    assert logits.shape == (batch, n_classes)
    assert probs.shape == (batch, n_classes)
    assert bool(jnp.all(jnp.isfinite(logits)))
    assert bool(jnp.all(jnp.abs(jnp.sum(probs, axis=-1) - 1.0) < 1e-3))
    print("KERNEL_OK")
</pallas_src>

<mosaic_0001>
module attributes {stable_mosaic.version = 11 : i64} {
  func.func @_conv_sigmoid_kernel(%arg0: i32, %arg1: memref<80x1664xbf16, #tpu.memory_space<vmem>>, %arg2: memref<8x80xbf16, #tpu.memory_space<vmem>>, %arg3: memref<8x1664xbf16, #tpu.memory_space<vmem>>) attributes {dimension_semantics = [#tpu.dimension_semantics<parallel>], iteration_bounds = array<i64: 1>, scalar_prefetch = 0 : i64, scratch_operands = 0 : i64, tpu.core_type = #tpu.core_type<tc>, window_params = [{transform_indices = @transform_0, window_bounds = array<i64: 80, 1664>}, {pipeline_mode = #tpu.pipeline_mode<synchronous>, transform_indices = @transform_1, window_bounds = array<i64: 8, 80>}, {transform_indices = @transform_2, window_bounds = array<i64: 8, 1664>}]} {
    %c0 = arith.constant 0 : index
    %c0_0 = arith.constant 0 : index
    %0 = vector.load %arg2[%c0, %c0_0] : memref<8x80xbf16, #tpu.memory_space<vmem>>, vector<8x80xbf16>
    %c0_1 = arith.constant 0 : index
    %c0_2 = arith.constant 0 : index
    %1 = vector.load %arg1[%c0_1, %c0_2] : memref<80x1664xbf16, #tpu.memory_space<vmem>>, vector<80x1664xbf16>
    %cst = arith.constant dense<0.000000e+00> : vector<8x1664xf32>
    %2 = tpu.matmul %0, %1, %cst {dimension_numbers = #tpu.dot_dimension_numbers<[1], [0], [0], [1], [0, 0, 1, 1], [], []>} : vector<8x80xbf16>, vector<80x1664xbf16>, vector<8x1664xf32> -> vector<8x1664xf32>
    %cst_3 = arith.constant 5.000000e-01 : f32
    %3 = vector.broadcast %cst_3 : f32 to vector<8x1664xf32>
    %4 = arith.mulf %3, %2 : vector<8x1664xf32>
    %5 = math.tanh %4 : vector<8x1664xf32>
    %cst_4 = arith.constant 1.000000e+00 : f32
    %6 = vector.broadcast %cst_4 : f32 to vector<8x1664xf32>
    %7 = arith.addf %5, %6 : vector<8x1664xf32>
    %cst_5 = arith.constant 5.000000e-01 : f32
    %8 = vector.broadcast %cst_5 : f32 to vector<8x1664xf32>
    %9 = arith.mulf %8, %7 : vector<8x1664xf32>
    %10 = arith.truncf %9 : vector<8x1664xf32> to vector<8x1664xbf16>
    %c0_6 = arith.constant 0 : index
    %c0_7 = arith.constant 0 : index
    %11 = vector.load %arg3[%c0_6, %c0_7] : memref<8x1664xbf16, #tpu.memory_space<vmem>>, vector<8x1664xbf16>
    tpu.vector_store %arg3[%c0_6, %c0_7], %10 {strides = array<i32>} : memref<8x1664xbf16, #tpu.memory_space<vmem>>, vector<8x1664xbf16>,
    return
  }
  func.func @transform_0(%arg0: i32) -> (i32, i32) {
    %c0_i32 = arith.constant 0 : i32
    %c0_i32_0 = arith.constant 0 : i32
    return %c0_i32, %arg0 : i32, i32
  }
  func.func @transform_1(%arg0: i32) -> (i32, i32) {
    %c0_i32 = arith.constant 0 : i32
    %c0_i32_0 = arith.constant 0 : i32
    %c0_i32_1 = arith.constant 0 : i32
    return %c0_i32, %c0_i32_0 : i32, i32
  }
  func.func @transform_2(%arg0: i32) -> (i32, i32) {
    %c0_i32 = arith.constant 0 : i32
    %c0_i32_0 = arith.constant 0 : i32
    return %c0_i32, %arg0 : i32, i32
  }
}

module attributes {stable_mosaic.version = 11 : i64} {
  func.func @_conv_sigmoid_kernel(%arg0: i32, %arg1: memref<160x256xbf16, #tpu.memory_space<vmem>>, %arg2: memref<16x160xbf16, #tpu.memory_space<vmem>>, %arg3: memref<16x256xbf16, #tpu.memory_space<vmem>>) attributes {dimension_semantics = [#tpu.dimension_semantics<parallel>], iteration_bounds = array<i64: 1>, scalar_prefetch = 0 : i64, scratch_operands = 0 : i64, tpu.core_type = #tpu.core_type<tc>, window_params = [{transform_indices = @transform_0, window_bounds = array<i64: 160, 256>}, {pipeline_mode = #tpu.pipeline_mode<synchronous>, transform_indices = @transform_1, window_bounds = array<i64: 16, 160>}, {transform_indices = @transform_2, window_bounds = array<i64: 16, 256>}]} {
    %c0 = arith.constant 0 : index
    %c0_0 = arith.constant 0 : index
    %0 = vector.load %arg2[%c0, %c0_0] : memref<16x160xbf16, #tpu.memory_space<vmem>>, vector<16x160xbf16>
    %c0_1 = arith.constant 0 : index
    %c0_2 = arith.constant 0 : index
    %1 = vector.load %arg1[%c0_1, %c0_2] : memref<160x256xbf16, #tpu.memory_space<vmem>>, vector<160x256xbf16>
    %cst = arith.constant dense<0.000000e+00> : vector<16x256xf32>
    %2 = tpu.matmul %0, %1, %cst {dimension_numbers = #tpu.dot_dimension_numbers<[1], [0], [0], [1], [0, 0, 1, 1], [], []>} : vector<16x160xbf16>, vector<160x256xbf16>, vector<16x256xf32> -> vector<16x256xf32>
    %cst_3 = arith.constant 5.000000e-01 : f32
    %3 = vector.broadcast %cst_3 : f32 to vector<16x256xf32>
    %4 = arith.mulf %3, %2 : vector<16x256xf32>
    %5 = math.tanh %4 : vector<16x256xf32>
    %cst_4 = arith.constant 1.000000e+00 : f32
    %6 = vector.broadcast %cst_4 : f32 to vector<16x256xf32>
    %7 = arith.addf %5, %6 : vector<16x256xf32>
    %cst_5 = arith.constant 5.000000e-01 : f32
    %8 = vector.broadcast %cst_5 : f32 to vector<16x256xf32>
    %9 = arith.mulf %8, %7 : vector<16x256xf32>
    %10 = arith.truncf %9 : vector<16x256xf32> to vector<16x256xbf16>
    %c0_6 = arith.constant 0 : index
    %c0_7 = arith.constant 0 : index
    %11 = vector.load %arg3[%c0_6, %c0_7] : memref<16x256xbf16, #tpu.memory_space<vmem>>, vector<16x256xbf16>
    tpu.vector_store %arg3[%c0_6, %c0_7], %10 {strides = array<i32>} : memref<16x256xbf16, #tpu.memory_space<vmem>>, vector<16x256xbf16>,
    return
  }
  func.func @transform_0(%arg0: i32) -> (i32, i32) {
    %c0_i32 = arith.constant 0 : i32
    %c0_i32_0 = arith.constant 0 : i32
    return %c0_i32, %arg0 : i32, i32
  }
  func.func @transform_1(%arg0: i32) -> (i32, i32) {
    %c0_i32 = arith.constant 0 : i32
    %c0_i32_0 = arith.constant 0 : i32
    %c0_i32_1 = arith.constant 0 : i32
    return %c0_i32, %c0_i32_0 : i32, i32
  }
  func.func @transform_2(%arg0: i32) -> (i32, i32) {
    %c0_i32 = arith.constant 0 : i32
    %c0_i32_0 = arith.constant 0 : i32
    return %c0_i32, %arg0 : i32, i32
  }
}

module attributes {stable_mosaic.version = 11 : i64} {
  func.func @_tail_kernel(%arg0: i32, %arg1: memref<8x400xbf16, #tpu.memory_space<vmem>>, %arg2: memref<400x128xbf16, #tpu.memory_space<vmem>>, %arg3: memref<1x128xf32, #tpu.memory_space<vmem>>, %arg4: memref<128x128xbf16, #tpu.memory_space<vmem>>, %arg5: memref<1x128xf32, #tpu.memory_space<vmem>>, %arg6: memref<128x128xbf16, #tpu.memory_space<vmem>>, %arg7: memref<1x128xf32, #tpu.memory_space<vmem>>, %arg8: memref<8x128xf32, #tpu.memory_space<vmem>>, %arg9: memref<8x128xf32, #tpu.memory_space<vmem>>) attributes {dimension_semantics = [#tpu.dimension_semantics<parallel>], iteration_bounds = array<i64: 1>, scalar_prefetch = 0 : i64, scratch_operands = 0 : i64, tpu.core_type = #tpu.core_type<tc>, window_params = [{transform_indices = @transform_0, window_bounds = array<i64: 8, 400>}, {pipeline_mode = #tpu.pipeline_mode<synchronous>, transform_indices = @transform_1, window_bounds = array<i64: 400, 128>}, {pipeline_mode = #tpu.pipeline_mode<synchronous>, transform_indices = @transform_2, window_bounds = array<i64: 1, 128>}, {pipeline_mode = #tpu.pipeline_mode<synchronous>, transform_indices = @transform_3, window_bounds = array<i64: 128, 128>}, {pipeline_mode = #tpu.pipeline_mode<synchronous>, transform_indices = @transform_4, window_bounds = array<i64: 1, 128>}, {pipeline_mode = #tpu.pipeline_mode<synchronous>, transform_indices = @transform_5, window_bounds = array<i64: 128, 128>}, {pipeline_mode = #tpu.pipeline_mode<synchronous>, transform_indices = @transform_6, window_bounds = array<i64: 1, 128>}, {transform_indices = @transform_7, window_bounds = array<i64: 8, 128>}, {transform_indices = @transform_8, window_bounds = array<i64: 8, 128>}]} {
    %c0 = arith.constant 0 : index
    %c0_0 = arith.constant 0 : index
    %0 = vector.load %arg1[%c0, %c0_0] : memref<8x400xbf16, #tpu.memory_space<vmem>>, vector<8x400xbf16>
    %c0_1 = arith.constant 0 : index
    %c0_2 = arith.constant 0 : index
    %1 = vector.load %arg2[%c0_1, %c0_2] : memref<400x128xbf16, #tpu.memory_space<vmem>>, vector<400x128xbf16>
    %cst = arith.constant dense<0.000000e+00> : vector<8x128xf32>
    %2 = tpu.matmul %0, %1, %cst {dimension_numbers = #tpu.dot_dimension_numbers<[1], [0], [0], [1], [0, 0, 1, 1], [], []>} : vector<8x400xbf16>, vector<400x128xbf16>, vector<8x128xf32> -> vector<8x128xf32>
    %c0_3 = arith.constant 0 : index
    %c0_4 = arith.constant 0 : index
    %3 = vector.load %arg3[%c0_3, %c0_4] : memref<1x128xf32, #tpu.memory_space<vmem>>, vector<1x128xf32>
    %4 = vector.broadcast %3 : vector<1x128xf32> to vector<8x128xf32>
    %5 = arith.addf %2, %4 : vector<8x128xf32>
    %6 = arith.truncf %5 : vector<8x128xf32> to vector<8x128xbf16>
    %c0_5 = arith.constant 0 : index
    %c0_6 = arith.constant 0 : index
    %7 = vector.load %arg4[%c0_5, %c0_6] : memref<128x128xbf16, #tpu.memory_space<vmem>>, vector<128x128xbf16>
    %cst_7 = arith.constant dense<0.000000e+00> : vector<8x128xf32>
    %8 = tpu.matmul %6, %7, %cst_7 {dimension_numbers = #tpu.dot_dimension_numbers<[1], [0], [0], [1], [0, 0, 1, 1], [], []>} : vector<8x128xbf16>, vector<128x128xbf16>, vector<8x128xf32> -> vector<8x128xf32>
    %c0_8 = arith.constant 0 : index
    %c0_9 = arith.constant 0 : index
    %9 = vector.load %arg5[%c0_8, %c0_9] : memref<1x128xf32, #tpu.memory_space<vmem>>, vector<1x128xf32>
    %10 = vector.broadcast %9 : vector<1x128xf32> to vector<8x128xf32>
    %11 = arith.addf %8, %10 : vector<8x128xf32>
    %cst_10 = arith.constant 5.000000e-01 : f32
    %12 = vector.broadcast %cst_10 : f32 to vector<8x128xf32>
    %13 = arith.mulf %12, %11 : vector<8x128xf32>
    %14 = math.tanh %13 : vector<8x128xf32>
    %cst_11 = arith.constant 1.000000e+00 : f32
    %15 = vector.broadcast %cst_11 : f32 to vector<8x128xf32>
    %16 = arith.addf %14, %15 : vector<8x128xf32>
    %cst_12 = arith.constant 5.000000e-01 : f32
    %17 = vector.broadcast %cst_12 : f32 to vector<8x128xf32>
    %18 = arith.mulf %17, %16 : vector<8x128xf32>
    %19 = arith.truncf %18 : vector<8x128xf32> to vector<8x128xbf16>
    %c0_13 = arith.constant 0 : index
    %c0_14 = arith.constant 0 : index
    %20 = vector.load %arg6[%c0_13, %c0_14] : memref<128x128xbf16, #tpu.memory_space<vmem>>, vector<128x128xbf16>
    %cst_15 = arith.constant dense<0.000000e+00> : vector<8x128xf32>
    %21 = tpu.matmul %19, %20, %cst_15 {dimension_numbers = #tpu.dot_dimension_numbers<[1], [0], [0], [1], [0, 0, 1, 1], [], []>} : vector<8x128xbf16>, vector<128x128xbf16>, vector<8x128xf32> -> vector<8x128xf32>
    %c0_16 = arith.constant 0 : index
    %c0_17 = arith.constant 0 : index
    %22 = vector.load %arg7[%c0_16, %c0_17] : memref<1x128xf32, #tpu.memory_space<vmem>>, vector<1x128xf32>
    %23 = vector.broadcast %22 : vector<1x128xf32> to vector<8x128xf32>
    %24 = arith.addf %21, %23 : vector<8x128xf32>
    %c0_18 = arith.constant 0 : index
    %c0_19 = arith.constant 0 : index
    %25 = vector.load %arg8[%c0_18, %c0_19] : memref<8x128xf32, #tpu.memory_space<vmem>>, vector<8x128xf32>
    tpu.vector_store %arg8[%c0_18, %c0_19], %24 {strides = array<i32>} : memref<8x128xf32, #tpu.memory_space<vmem>>, vector<8x128xf32>,
    %cst_20 = arith.constant dense<0xFF800000> : vector<8xf32>
    %26 = vector.multi_reduction <maximumf>, %24, %cst_20 [1] : vector<8x128xf32> to vector<8xf32>
    %27 = vector.shape_cast %26 : vector<8xf32> to vector<8x1xf32>
    %28 = vector.broadcast %27 : vector<8x1xf32> to vector<8x128xf32>
    %29 = arith.subf %24, %28 : vector<8x128xf32>
    %30 = math.exp %29 : vector<8x128xf32>
    %cst_21 = arith.constant dense<0.000000e+00> : vector<8xf32>
    %31 = vector.multi_reduction <add>, %30, %cst_21 [1] : vector<8x128xf32> to vector<8xf32>
    %32 = vector.shape_cast %31 : vector<8xf32> to vector<8x1xf32>
    %33 = vector.broadcast %32 : vector<8x1xf32> to vector<8x128xf32>
    %34 = arith.divf %30, %33 : vector<8x128xf32>
    %c0_22 = arith.constant 0 : index
    %c0_23 = arith.constant 0 : index
    %35 = vector.load %arg9[%c0_22, %c0_23] : memref<8x128xf32, #tpu.memory_space<vmem>>, vector<8x128xf32>
    tpu.vector_store %arg9[%c0_22, %c0_23], %34 {strides = array<i32>} : memref<8x128xf32, #tpu.memory_space<vmem>>, vector<8x128xf32>,
    return
  }
  func.func @transform_0(%arg0: i32) -> (i32, i32) {
    %c0_i32 = arith.constant 0 : i32
    %c0_i32_0 = arith.constant 0 : i32
    return %arg0, %c0_i32 : i32, i32
  }
  func.func @transform_1(%arg0: i32) -> (i32, i32) {
    %c0_i32 = arith.constant 0 : i32
    %c0_i32_0 = arith.constant 0 : i32
    %c0_i32_1 = arith.constant 0 : i32
    return %c0_i32, %c0_i32_0 : i32, i32
  }
  func.func @transform_2(%arg0: i32) -> (i32, i32) {
    %c0_i32 = arith.constant 0 : i32
    %c0_i32_0 = arith.constant 0 : i32
    %c0_i32_1 = arith.constant 0 : i32
    return %c0_i32, %c0_i32_0 : i32, i32
  }
  func.func @transform_3(%arg0: i32) -> (i32, i32) {
    %c0_i32 = arith.constant 0 : i32
    %c0_i32_0 = arith.constant 0 : i32
    %c0_i32_1 = arith.constant 0 : i32
    return %c0_i32, %c0_i32_0 : i32, i32
  }
  func.func @transform_4(%arg0: i32) -> (i32, i32) {
    %c0_i32 = arith.constant 0 : i32
    %c0_i32_0 = arith.constant 0 : i32
    %c0_i32_1 = arith.constant 0 : i32
    return %c0_i32, %c0_i32_0 : i32, i32
  }
  func.func @transform_5(%arg0: i32) -> (i32, i32) {
    %c0_i32 = arith.constant 0 : i32
    %c0_i32_0 = arith.constant 0 : i32
    %c0_i32_1 = arith.constant 0 : i32
    return %c0_i32, %c0_i32_0 : i32, i32
  }
  func.func @transform_6(%arg0: i32) -> (i32, i32) {
    %c0_i32 = arith.constant 0 : i32
    %c0_i32_0 = arith.constant 0 : i32
    %c0_i32_1 = arith.constant 0 : i32
    return %c0_i32, %c0_i32_0 : i32, i32
  }
  func.func @transform_7(%arg0: i32) -> (i32, i32) {
    %c0_i32 = arith.constant 0 : i32
    %c0_i32_0 = arith.constant 0 : i32
    return %arg0, %c0_i32 : i32, i32
  }
  func.func @transform_8(%arg0: i32) -> (i32, i32) {
    %c0_i32 = arith.constant 0 : i32
    %c0_i32_0 = arith.constant 0 : i32
    return %arg0, %c0_i32 : i32, i32
  }
}

</mosaic_0001>

<bundles_post_ra>
// kernel: lenet5_forward.3
= control target key start
LH: loop header
LB: loop body
LE: loop exit
PB: predicated region body
PF: predicated region fallthrough
CT: control target
= control target key end

     0   :  { %vm413_vm0 = vcmask 654336   ;;  %s1477_s0 = inlined_call_operand.vmem [shape: bf16[80,1664], index: 0, kind: input, shape index: {}]   ;;  %s1478_s1 = inlined_call_operand.vmem [shape: bf16[8,80], index: 1, kind: input, shape index: {}]   ;;  %s1479_s2 = inlined_call_operand.vmem [shape: bf16[8,1664], index: 2, kind: output, shape index: {}]  }
   0x1   :  { %v866_v0 = vld [vmem:[%s1477_s0 + $0x1a0] sm:$0xf]  ;;  %v987_v1 = vld [vmem:[%s1477_s0 + $0x1d0] sm:$0xf0]  ;;  %v981_v2 = vld [vmem:[%s1477_s0 + $0x1a4] sm:$0xf] }
   0x2   :  { %v867_v3 = vor.u32 %v987_v1, %v866_v0  ;;  %v868_v4 = vld [vmem:[%s1477_s0 + $0x1d4] sm:$0xf0]  ;;  %v874_v5 = vld [vmem:[%s1477_s0 + $0x1a8] sm:$0xf]  ;;  %v988_v6 = vld [vmem:[%s1477_s0 + $0x1d8] sm:$0xf0] }
   0x3   :  { %v871_v7 = vor.u32 %v981_v2, %v868_v4  ;;  %v875_v8 = vor.u32 %v988_v6, %v874_v5  ;;  %v982_v9 = vld [vmem:[%s1477_s0 + $0x1ac] sm:$0xf]  ;;  %v876_v10 = vld [vmem:[%s1477_s0 + $0x1dc] sm:$0xf0]  ;;  %v814_v11 = vld [vmem:[%s1477_s0 + $0x138] sm:$0xf] }
   0x4   :  { %420 = vmatpush.bf16.msra.mxu0 %v867_v3  ;;  %v879_v12 = vor.u32 %v982_v9, %v876_v10  ;;  %v974_v13 = vld [vmem:[%s1477_s0 + $0x168] sm:$0xf0]  ;;  %v968_v14 = vld [vmem:[%s1477_s0 + $0x13c] sm:$0xf]  ;;  %v816_v15 = vld [vmem:[%s1477_s0 + $0x16c] sm:$0xf0] }
   0x5   :  { %433 = vmatpush.bf16.msra.mxu1 %v871_v7  ;;  %446 = vmatpush.bf16.msra.mxu2 %v875_v8  ;;  %v815_v16 = vor.u32 %v974_v13, %v814_v11  ;;  %v819_v17 = vor.u32 %v968_v14, %v816_v15  ;;  %v822_v18 = vld [vmem:[%s1477_s0 + $0x140] sm:$0xf]  ;;  %v975_v19 = vld [vmem:[%s1477_s0 + $0x170] sm:$0xf0]  ;;  %v969_v20 = vld [vmem:[%s1477_s0 + $0x144] sm:$0xf] }
   0x6   :  { %459 = vmatpush.bf16.msra.mxu3 %v879_v12  ;;  %v823_v21 = vor.u32 %v975_v19, %v822_v18  ;;  %v824_v22 = vld [vmem:[%s1477_s0 + $0x174] sm:$0xf0]  ;;  %v762_v23 = vld [vmem:[%s1477_s0 + $0xd0] sm:$0xf]  ;;  %v961_v24 = vld [vmem:[%s1477_s0 + $0x100] sm:$0xf0] }
   0x7   :  { %v827_v25 = vor.u32 %v969_v20, %v824_v22  ;;  %v955_v26 = vld [vmem:[%s1477_s0 + $0xd4] sm:$0xf]  ;;  %v764_v27 = vld [vmem:[%s1477_s0 + $0x104] sm:$0xf0]  ;;  %v770_v28 = vld [vmem:[%s1477_s0 + $0xd8] sm:$0xf]  ;;  %v763_v29 = vor.u32 %v961_v24, %v762_v23 }
   0x8   :  { %421 = vmatpush.bf16.msra.mxu0 %v815_v16  ;;  %v962_v30 = vld [vmem:[%s1477_s0 + $0x108] sm:$0xf0]  ;;  %v956_v31 = vld [vmem:[%s1477_s0 + $0xdc] sm:$0xf]  ;;  %v772_v32 = vld [vmem:[%s1477_s0 + $0x10c] sm:$0xf0]  ;;  %v767_v33 = vor.u32 %v955_v26, %v764_v27 }
   0x9   :  { %434 = vmatpush.bf16.msra.mxu1 %v819_v17  ;;  %447 = vmatpush.bf16.msra.mxu2 %v823_v21  ;;  %v771_v34 = vor.u32 %v962_v30, %v770_v28  ;;  %v710_v35 = vld [vmem:[%s1477_s0 + $0x68] sm:$0xf]  ;;  %v948_v36 = vld [vmem:[%s1477_s0 + $0x98] sm:$0xf0]  ;;  %v942_v37 = vld [vmem:[%s1477_s0 + $0x6c] sm:$0xf]  ;;  %v775_v38 = vor.u32 %v956_v31, %v772_v32 }
   0xa   :  { %460 = vmatpush.bf16.msra.mxu3 %v827_v25  ;;  %v712_v39 = vld [vmem:[%s1477_s0 + $0x9c] sm:$0xf0]  ;;  %v718_v40 = vld [vmem:[%s1477_s0 + $0x70] sm:$0xf]  ;;  %v949_v41 = vld [vmem:[%s1477_s0 + $0xa0] sm:$0xf0]  ;;  %v711_v44 = vor.u32 %v948_v36, %v710_v35 }
   0xb   :  { %v943_v42 = vld [vmem:[%s1477_s0 + $0x74] sm:$0xf]  ;;  %v720_v43 = vld [vmem:[%s1477_s0 + $0xa4] sm:$0xf0]  ;;  %v658_v45 = vld [vmem:[%s1477_s0] sm:$0xf]  ;;  %v715_v46 = vor.u32 %v942_v37, %v712_v39  ;;  %v719_v47 = vor.u32 %v949_v41, %v718_v40 }
   0xc   :  { %422 = vmatpush.bf16.msra.mxu0 %v763_v29  ;;  %v935_v48 = vld [vmem:[%s1477_s0 + $0x30] sm:$0xf0]  ;;  %v929_v49 = vld [vmem:[%s1477_s0 + $0x4] sm:$0xf]  ;;  %v660_v50 = vld [vmem:[%s1477_s0 + $0x34] sm:$0xf0]  ;;  %v723_v51 = vor.u32 %v943_v42, %v720_v43 }
   0xd   :  { %435 = vmatpush.bf16.msra.mxu1 %v767_v33  ;;  %448 = vmatpush.bf16.msra.mxu2 %v771_v34  ;;  %v882_v52 = vld [vmem:[%s1477_s0 + $0x1b0] sm:$0xf]  ;;  %v989_v53 = vld [vmem:[%s1477_s0 + $0x1e0] sm:$0xf0]  ;;  %v983_v54 = vld [vmem:[%s1477_s0 + $0x1b4] sm:$0xf]  ;;  %v659_v58 = vor.u32 %v935_v48, %v658_v45  ;;  %v663_v62 = vor.u32 %v929_v49, %v660_v50 }
   0xe   :  { %461 = vmatpush.bf16.msra.mxu3 %v775_v38  ;;  %v884_v55 = vld [vmem:[%s1477_s0 + $0x1e4] sm:$0xf0]  ;;  %v936_v57 = vld [vmem:[%s1477_s0 + $0x38] sm:$0xf0]  ;;  %v930_v59 = vld [vmem:[%s1477_s0 + $0xc] sm:$0xf]  ;;  %v883_v63 = vor.u32 %v989_v53, %v882_v52 }
   0xf   :  { %v666_v56 = vld [vmem:[%s1477_s0 + $0x8] sm:$0xf]  ;;  %v668_v60 = vld [vmem:[%s1477_s0 + $0x3c] sm:$0xf0]  ;;  %v890_v61 = vld [vmem:[%s1477_s0 + $0x1b8] sm:$0xf]  ;;  %v887_v3 = vor.u32 %v983_v54, %v884_v55 }
  0x10   :  { %423 = vmatpush.bf16.msra.mxu0 %v711_v44  ;;  %v990_v0 = vld [vmem:[%s1477_s0 + $0x1e8] sm:$0xf0]  ;;  %v984_v1 = vld [vmem:[%s1477_s0 + $0x1bc] sm:$0xf]  ;;  %v892_v2 = vld [vmem:[%s1477_s0 + $0x1ec] sm:$0xf0]  ;;  %v667_v4 = vor.u32 %v936_v57, %v666_v56  ;;  %v671_v7 = vor.u32 %v930_v59, %v668_v60 }
  0x11   :  { %436 = vmatpush.bf16.msra.mxu1 %v715_v46  ;;  %449 = vmatpush.bf16.msra.mxu2 %v719_v47  ;;  %v830_v5 = vld [vmem:[%s1477_s0 + $0x148] sm:$0xf]  ;;  %v976_v6 = vld [vmem:[%s1477_s0 + $0x178] sm:$0xf0]  ;;  %v970_v8 = vld [vmem:[%s1477_s0 + $0x14c] sm:$0xf]  ;;  %v891_v11 = vor.u32 %v990_v0, %v890_v61  ;;  %v895_v12 = vor.u32 %v984_v1, %v892_v2 }
  0x12   :  { %462 = vmatpush.bf16.msra.mxu3 %v723_v51  ;;  %v832_v9 = vld [vmem:[%s1477_s0 + $0x17c] sm:$0xf0]  ;;  %v838_v13 = vld [vmem:[%s1477_s0 + $0x150] sm:$0xf]  ;;  %v831_v14 = vor.u32 %v976_v6, %v830_v5  ;;  %v977_v15 = vld [vmem:[%s1477_s0 + $0x180] sm:$0xf0] }
  0x13   :  { %v1194_v10 = vld [vmem:[%s1478_s1] sm:$0xf]  ;;  %v971_v16 = vld [vmem:[%s1477_s0 + $0x154] sm:$0xf]  ;;  %v840_v17 = vld [vmem:[%s1477_s0 + $0x184] sm:$0xf0]  ;;  %v835_v18 = vor.u32 %v970_v8, %v832_v9  ;;  %v839_v23 = vor.u32 %v977_v15, %v838_v13 }
  0x14   :  { %424 = vmatpush.bf16.msra.mxu0 %v659_v58  ;;  %v778_v19 = vld [vmem:[%s1477_s0 + $0xe0] sm:$0xf]  ;;  %v963_v20 = vld [vmem:[%s1477_s0 + $0x110] sm:$0xf0]  ;;  %v957_v21 = vld [vmem:[%s1477_s0 + $0xe4] sm:$0xf]  ;;  %v843_v24 = vor.u32 %v971_v16, %v840_v17 }
  0x15   :  { %437 = vmatpush.bf16.msra.mxu1 %v663_v62  ;;  %450 = vmatpush.bf16.msra.mxu2 %v667_v4  ;;  %v780_v22 = vld [vmem:[%s1477_s0 + $0x114] sm:$0xf0]  ;;  %v786_v25 = vld [vmem:[%s1477_s0 + $0xe8] sm:$0xf]  ;;  %v779_v26 = vor.u32 %v963_v20, %v778_v19  ;;  %v964_v27 = vld [vmem:[%s1477_s0 + $0x118] sm:$0xf0] }
  0x16   :  { %463 = vmatpush.bf16.msra.mxu3 %v671_v7  ;;  %v958_v28 = vld [vmem:[%s1477_s0 + $0xec] sm:$0xf]  ;;  %v788_v29 = vld [vmem:[%s1477_s0 + $0x11c] sm:$0xf0]  ;;  %v783_v30 = vor.u32 %v957_v21, %v780_v22  ;;  %v726_v31 = vld [vmem:[%s1477_s0 + $0x78] sm:$0xf]  ;;  %v787_v35 = vor.u32 %v964_v27, %v786_v25 }
  0x17   :  { %916 = vmatmul.msk.bf16.vlgmr.msra.gmra.mxu0 %vm413_vm0, %v1194_v10  ;;  %v950_v32 = vld [vmem:[%s1477_s0 + $0xa8] sm:$0xf0]  ;;  %v944_v33 = vld [vmem:[%s1477_s0 + $0x7c] sm:$0xf]  ;;  %v728_v34 = vld [vmem:[%s1477_s0 + $0xac] sm:$0xf0]  ;;  %v791_v36 = vor.u32 %v958_v28, %v788_v29 }
  0x18   :  { %472 = vmatpush.bf16.msrb.mxu0 %v883_v63  ;;  %917 = vmatmul.msk.bf16.vlgmr.msra.gmra.mxu1 %vm413_vm0, %v1194_v10  ;;  %v734_v37 = vld [vmem:[%s1477_s0 + $0x80] sm:$0xf]  ;;  %v727_v38 = vor.u32 %v950_v32, %v726_v31  ;;  %v951_v39 = vld [vmem:[%s1477_s0 + $0xb0] sm:$0xf0]  ;;  %v945_v40 = vld [vmem:[%s1477_s0 + $0x84] sm:$0xf]  ;;  %v731_v42 = vor.u32 %v944_v33, %v728_v34 }
  0x19   :  { %485 = vmatpush.bf16.msrb.mxu1 %v887_v3  ;;  %498 = vmatpush.bf16.msrb.mxu2 %v891_v11  ;;  %v736_v41 = vld [vmem:[%s1477_s0 + $0xb4] sm:$0xf0]  ;;  %v674_v43 = vld [vmem:[%s1477_s0 + $0x10] sm:$0xf]  ;;  %v937_v44 = vld [vmem:[%s1477_s0 + $0x40] sm:$0xf0]  ;;  %v735_v49 = vor.u32 %v951_v39, %v734_v37 }
  0x1a   :  { %511 = vmatpush.bf16.msrb.mxu3 %v895_v12  ;;  %918 = vmatmul.msk.bf16.vlgmr.msra.gmra.mxu2 %vm413_vm0, %v1194_v10  ;;  %v931_v45 = vld [vmem:[%s1477_s0 + $0x14] sm:$0xf]  ;;  %v676_v46 = vld [vmem:[%s1477_s0 + $0x44] sm:$0xf0]  ;;  %v898_v47 = vld [vmem:[%s1477_s0 + $0x1c0] sm:$0xf]  ;;  %v739_v50 = vor.u32 %v945_v40, %v736_v41  ;;  %v675_v53 = vor.u32 %v937_v44, %v674_v43 }
  0x1b   :  { %919 = vmatmul.msk.bf16.vlgmr.msra.gmra.mxu3 %vm413_vm0, %v1194_v10  ;;  %v991_v48 = vld [vmem:[%s1477_s0 + $0x1f0] sm:$0xf0]  ;;  %v985_v51 = vld [vmem:[%s1477_s0 + $0x1c4] sm:$0xf]  ;;  %v900_v52 = vld [vmem:[%s1477_s0 + $0x1f4] sm:$0xf0]  ;;  %v679_v57 = vor.u32 %v931_v45, %v676_v46 }
  0x1c   :  { %473 = vmatpush.bf16.msrb.mxu0 %v831_v14  ;;  %v682_v54 = vld [vmem:[%s1477_s0 + $0x18] sm:$0xf]  ;;  %v938_v55 = vld [vmem:[%s1477_s0 + $0x48] sm:$0xf0]  ;;  %v932_v56 = vld [vmem:[%s1477_s0 + $0x1c] sm:$0xf]  ;;  %v899_v58 = vor.u32 %v991_v48, %v898_v47  ;;  %v903_v62 = vor.u32 %v985_v51, %v900_v52 }
  0x1d   :  { %486 = vmatpush.bf16.msrb.mxu1 %v835_v18  ;;  %499 = vmatpush.bf16.msrb.mxu2 %v839_v23  ;;  %v684_v59 = vld [vmem:[%s1477_s0 + $0x4c] sm:$0xf0]  ;;  %v906_v60 = vld [vmem:[%s1477_s0 + $0x1c8] sm:$0xf]  ;;  %v992_v61 = vld [vmem:[%s1477_s0 + $0x1f8] sm:$0xf0]  ;;  %v683_v2 = vor.u32 %v938_v55, %v682_v54 }
  0x1e   :  { %512 = vmatpush.bf16.msrb.mxu3 %v843_v24  ;;  %v986_v63 = vld [vmem:[%s1477_s0 + $0x1cc] sm:$0xf]  ;;  %v908_v0 = vld [vmem:[%s1477_s0 + $0x1fc] sm:$0xf0]  ;;  %v846_v1 = vld [vmem:[%s1477_s0 + $0x158] sm:$0xf]  ;;  %v687_v6 = vor.u32 %v932_v56, %v684_v59  ;;  %v907_v7 = vor.u32 %v992_v61, %v906_v60 }
  0x1f   :  { %v978_v3 = vld [vmem:[%s1477_s0 + $0x188] sm:$0xf0]  ;;  %v972_v4 = vld [vmem:[%s1477_s0 + $0x15c] sm:$0xf]  ;;  %v848_v5 = vld [vmem:[%s1477_s0 + $0x18c] sm:$0xf0]  ;;  %v911_v8 = vor.u32 %v986_v63, %v908_v0 }
  0x20   :  { %474 = vmatpush.bf16.msrb.mxu0 %v779_v26  ;;  %v854_v9 = vld [vmem:[%s1477_s0 + $0x160] sm:$0xf]  ;;  %v979_v11 = vld [vmem:[%s1477_s0 + $0x190] sm:$0xf0]  ;;  %v847_v12 = vor.u32 %v978_v3, %v846_v1  ;;  %v851_v13 = vor.u32 %v972_v4, %v848_v5  ;;  %v973_v14 = vld [vmem:[%s1477_s0 + $0x164] sm:$0xf] }
  0x21   :  { %487 = vmatpush.bf16.msrb.mxu1 %v783_v30  ;;  %500 = vmatpush.bf16.msrb.mxu2 %v787_v35  ;;  %v856_v15 = vld [vmem:[%s1477_s0 + $0x194] sm:$0xf0]  ;;  %v794_v16 = vld [vmem:[%s1477_s0 + $0xf0] sm:$0xf]  ;;  %v965_v17 = vld [vmem:[%s1477_s0 + $0x120] sm:$0xf0]  ;;  %v855_v20 = vor.u32 %v979_v11, %v854_v9 }
  0x22   :  { %513 = vmatpush.bf16.msrb.mxu3 %v791_v36  ;;  %v959_v18 = vld [vmem:[%s1477_s0 + $0xf4] sm:$0xf]  ;;  %v796_v19 = vld [vmem:[%s1477_s0 + $0x124] sm:$0xf0]  ;;  %v859_v21 = vor.u32 %v973_v14, %v856_v15  ;;  %v802_v22 = vld [vmem:[%s1477_s0 + $0xf8] sm:$0xf]  ;;  %v795_v24 = vor.u32 %v965_v17, %v794_v16 }
  0x23   :  { %v966_v23 = vld [vmem:[%s1477_s0 + $0x128] sm:$0xf0]  ;;  %v799_v25 = vor.u32 %v959_v18, %v796_v19  ;;  %v960_v26 = vld [vmem:[%s1477_s0 + $0xfc] sm:$0xf]  ;;  %v804_v27 = vld [vmem:[%s1477_s0 + $0x12c] sm:$0xf0] }
  0x24   :  { %475 = vmatpush.bf16.msrb.mxu0 %v727_v38  ;;  %v742_v28 = vld [vmem:[%s1477_s0 + $0x88] sm:$0xf]  ;;  %v952_v29 = vld [vmem:[%s1477_s0 + $0xb8] sm:$0xf0]  ;;  %v946_v30 = vld [vmem:[%s1477_s0 + $0x8c] sm:$0xf]  ;;  %v803_v32 = vor.u32 %v966_v23, %v802_v22  ;;  %v807_v33 = vor.u32 %v960_v26, %v804_v27 }
  0x25   :  { %488 = vmatpush.bf16.msrb.mxu1 %v731_v42  ;;  %501 = vmatpush.bf16.msrb.mxu2 %v735_v49  ;;  %v744_v31 = vld [vmem:[%s1477_s0 + $0xbc] sm:$0xf0]  ;;  %v750_v34 = vld [vmem:[%s1477_s0 + $0x90] sm:$0xf]  ;;  %v953_v35 = vld [vmem:[%s1477_s0 + $0xc0] sm:$0xf0]  ;;  %v743_v36 = vor.u32 %v952_v29, %v742_v28 }
  0x26   :  { %514 = vmatpush.bf16.msrb.mxu3 %v739_v50  ;;  %v747_v37 = vor.u32 %v946_v30, %v744_v31  ;;  %v947_v38 = vld [vmem:[%s1477_s0 + $0x94] sm:$0xf]  ;;  %v752_v39 = vld [vmem:[%s1477_s0 + $0xc4] sm:$0xf0]  ;;  %v690_v40 = vld [vmem:[%s1477_s0 + $0x20] sm:$0xf]  ;;  %v751_v44 = vor.u32 %v953_v35, %v750_v34 }
  0x27   :  { %v939_v41 = vld [vmem:[%s1477_s0 + $0x50] sm:$0xf0]  ;;  %v933_v42 = vld [vmem:[%s1477_s0 + $0x24] sm:$0xf]  ;;  %v692_v43 = vld [vmem:[%s1477_s0 + $0x54] sm:$0xf0]  ;;  %v755_v47 = vor.u32 %v947_v38, %v752_v39 }
  0x28   :  { %476 = vmatpush.bf16.msrb.mxu0 %v675_v53  ;;  %v914_v45 = vld [vmem:[%s1477_s0 + $0x1d0] sm:$0xf]  ;;  %v993_v46 = vld [vmem:[%s1477_s0 + $0x200] sm:$0xf0]  ;;  %v698_v48 = vld [vmem:[%s1477_s0 + $0x28] sm:$0xf]  ;;  %v691_v50 = vor.u32 %v939_v41, %v690_v40  ;;  %v695_v51 = vor.u32 %v933_v42, %v692_v43 }
  0x29   :  { %489 = vmatpush.bf16.msrb.mxu1 %v679_v57  ;;  %502 = vmatpush.bf16.msrb.mxu2 %v683_v2  ;;  %v940_v49 = vld [vmem:[%s1477_s0 + $0x58] sm:$0xf0]  ;;  %v934_v52 = vld [vmem:[%s1477_s0 + $0x2c] sm:$0xf]  ;;  %v700_v53 = vld [vmem:[%s1477_s0 + $0x5c] sm:$0xf0]  ;;  %v915_v54 = vor.u32 %v993_v46, %v914_v45 }
  0x2a   :  { %515 = vmatpush.bf16.msrb.mxu3 %v687_v6  ;;  %v699_v55 = vor.u32 %v940_v49, %v698_v48  ;;  %v862_v56 = vld [vmem:[%s1477_s0 + $0x168] sm:$0xf]  ;;  %v980_v57 = vld [vmem:[%s1477_s0 + $0x198] sm:$0xf0]  ;;  %v810_v60 = vld [vmem:[%s1477_s0 + $0x100] sm:$0xf] }
  0x2b   :  { %920 = vmatmul.msk.bf16.vlgmr.msrb.gmra.mxu0 %vm413_vm0, %v1194_v10  ;;  %v863_v59 = vor.u32 %v980_v57, %v862_v56  ;;  %v967_v61 = vld [vmem:[%s1477_s0 + $0x130] sm:$0xf0]  ;;  %v758_v63 = vld [vmem:[%s1477_s0 + $0x98] sm:$0xf]  ;;  %v954_v0 = vld [vmem:[%s1477_s0 + $0xc8] sm:$0xf0] }
  0x2c   :  { %524 = vmatpush.bf16.msra.mxu0 %v899_v58  ;;  %921 = vmatmul.msk.bf16.vlgmr.msrb.gmra.mxu1 %vm413_vm0, %v1194_v10  ;;  %v703_v58 = vor.u32 %v934_v52, %v700_v53  ;;  %v759_v1 = vor.u32 %v954_v0, %v758_v63  ;;  %v706_v2 = vld [vmem:[%s1477_s0 + $0x30] sm:$0xf]  ;;  %v941_v3 = vld [vmem:[%s1477_s0 + $0x60] sm:$0xf0] }
  0x2d   :  { %537 = vmatpush.bf16.msra.mxu1 %v903_v62  ;;  %550 = vmatpush.bf16.msra.mxu2 %v907_v7  ;;  %v811_v62 = vor.u32 %v967_v61, %v810_v60  ;;  %v707_v4 = vor.u32 %v941_v3, %v706_v2 }
  0x2e   :  { %563 = vmatpush.bf16.msra.mxu3 %v911_v8  ;;  %922 = vmatmul.msk.bf16.vlgmr.msrb.gmra.mxu2 %vm413_vm0, %v1194_v10 }
  0x2f   :  { %923 = vmatmul.msk.bf16.vlgmr.msrb.gmra.mxu3 %vm413_vm0, %v1194_v10 }
  0x30   :  { %525 = vmatpush.bf16.msra.mxu0 %v847_v12 }
  0x31   :  { %538 = vmatpush.bf16.msra.mxu1 %v851_v13  ;;  %551 = vmatpush.bf16.msra.mxu2 %v855_v20 }
  0x32   :  { %564 = vmatpush.bf16.msra.mxu3 %v859_v21 }
  0x34   :  { %526 = vmatpush.bf16.msra.mxu0 %v795_v24 }
  0x35   :  { %539 = vmatpush.bf16.msra.mxu1 %v799_v25  ;;  %552 = vmatpush.bf16.msra.mxu2 %v803_v32 }
  0x36   :  { %565 = vmatpush.bf16.msra.mxu3 %v807_v33 }
  0x38   :  { %527 = vmatpush.bf16.msra.mxu0 %v743_v36 }
  0x39   :  { %540 = vmatpush.bf16.msra.mxu1 %v747_v37  ;;  %553 = vmatpush.bf16.msra.mxu2 %v751_v44 }
  0x3a   :  { %566 = vmatpush.bf16.msra.mxu3 %v755_v47 }
  0x3c   :  { %528 = vmatpush.bf16.msra.mxu0 %v691_v50 }
  0x3d   :  { %541 = vmatpush.bf16.msra.mxu1 %v695_v51  ;;  %554 = vmatpush.bf16.msra.mxu2 %v699_v55 }
  0x3e   :  { %567 = vmatpush.bf16.msra.mxu3 %v703_v58 }
  0x3f   :  { %924 = vmatmul.msk.bf16.vlgmr.msra.gmra.mxu0 %vm413_vm0, %v1194_v10 }
  0x40   :  { %576 = vmatpush.bf16.msrb.mxu0 %v915_v54  ;;  %925 = vmatmul.msk.bf16.vlgmr.msra.gmra.mxu1 %vm413_vm0, %v1194_v10 }
  0x41   :  { %926 = vmatmul.msk.bf16.vlgmr.msra.gmra.mxu2 %vm413_vm0, %v1194_v10  ;;  %927 = vmatmul.msk.bf16.vlgmr.msra.gmra.mxu3 %vm413_vm0, %v1194_v10 }
  0x44   :  { %577 = vmatpush.bf16.msrb.mxu0 %v863_v59 }
  0x48   :  { %578 = vmatpush.bf16.msrb.mxu0 %v811_v62 }
  0x4c   :  { %579 = vmatpush.bf16.msrb.mxu0 %v759_v1 }
  0x50   :  { %580 = vmatpush.bf16.msrb.mxu0 %v707_v4 }
  0x53   :  { %928 = vmatmul.msk.bf16.vlgmr.msrb.gmra.mxu0 %vm413_vm0, %v1194_v10 }
  0x94   :  { %v426_v5 = vpop.f32.mrf.mxu0 }
  0x95   :  { %v586_v6 = vmul.f32 0.5, %v426_v5  ;;  %v439_v7 = vpop.f32.mrf.mxu1 }
  0x96   :  { %v587_v8 = vmul.f32 0.5, %v439_v7 }
  0x97   :  { %994 = vtanh.f32 %v586_v6 }
  0x98   :  { %996 = vtanh.f32 %v587_v8 }
  0x9c   :  { %v428_v9 = vpop.f32.mrf.mxu0 }
  0x9d   :  { %v995_v11 = vpop.eup %994  ;;  %v452_v12 = vpop.f32.mrf.mxu2 }
  0x9e   :  { %v612_v13 = vadd.f32 1.0, %v995_v11  ;;  %v441_v14 = vpop.f32.mrf.mxu1  ;;  %v588_v15 = vmul.f32 0.5, %v452_v12  ;;  %v465_v16 = vpop.f32.mrf.mxu3 }
  0x9f   :  { %v997_v17 = vpop.eup %996  ;;  %v589_v18 = vmul.f32 0.5, %v465_v16 }
  0xa0   :  { %v625_v19 = vmul.f32 0.5, %v612_v13  ;;  %v613_v20 = vadd.f32 1.0, %v997_v17  ;;  %998 = vtanh.f32 %v588_v15 }
  0xa1   :  { %1000 = vtanh.f32 %v589_v18 }
  0xa2   :  { %v626_v10 = vmul.f32 0.5, %v613_v20 }
  0xa4   :  { %v638_v21 = vpack.c.bf16 %v626_v10, %v625_v19 }
  0xa5   :  { %v454_v23 = vpop.f32.mrf.mxu2 }
  0xa6   :  { %v999_v24 = vpop.eup %998  ;;  %645 = vst [vmem:[%s1479_s2] sm:$0xff] %v638_v21  ;;  %v467_v26 = vpop.f32.mrf.mxu3 }
  0xa7   :  { %v1001_v27 = vpop.eup %1000  ;;  %v614_v28 = vadd.f32 1.0, %v999_v24 }
  0xa8   :  { %v478_v22 = vpop.f32.mrf.mxu0  ;;  %v615_v30 = vadd.f32 1.0, %v1001_v27 }
  0xa9   :  { %v590_v25 = vmul.f32 0.5, %v478_v22  ;;  %v491_v29 = vpop.f32.mrf.mxu1  ;;  %v627_v32 = vmul.f32 0.5, %v614_v28 }
  0xaa   :  { %v591_v31 = vmul.f32 0.5, %v491_v29  ;;  %v628_v33 = vmul.f32 0.5, %v615_v30 }
  0xab   :  { %1002 = vtanh.f32 %v590_v25 }
  0xac   :  { %1004 = vtanh.f32 %v591_v31  ;;  %v639_v34 = vpack.c.bf16 %v628_v33, %v627_v32 }
  0xae   :  { %646 = vst [vmem:[%s1479_s2 + $0x8] sm:$0xff] %v639_v34 }
  0xb0   :  { %v480_v35 = vpop.f32.mrf.mxu0 }
  0xb1   :  { %v1003_v36 = vpop.eup %1002  ;;  %v493_v38 = vpop.f32.mrf.mxu1 }
  0xb2   :  { %v616_v37 = vadd.f32 1.0, %v1003_v36  ;;  %v504_v39 = vpop.f32.mrf.mxu2  ;;  %v1005_v40 = vpop.eup %1004 }
  0xb3   :  { %v592_v41 = vmul.f32 0.5, %v504_v39  ;;  %v517_v42 = vpop.f32.mrf.mxu3  ;;  %v617_v44 = vadd.f32 1.0, %v1005_v40 }
  0xb4   :  { %v629_v43 = vmul.f32 0.5, %v616_v37  ;;  %v593_v45 = vmul.f32 0.5, %v517_v42 }
  0xb5   :  { %1006 = vtanh.f32 %v592_v41  ;;  %v630_v46 = vmul.f32 0.5, %v617_v44 }
  0xb6   :  { %1008 = vtanh.f32 %v593_v45 }
  0xb7   :  { %v640_v47 = vpack.c.bf16 %v630_v46, %v629_v43 }
  0xb9   :  { %647 = vst [vmem:[%s1479_s2 + $0x10] sm:$0xff] %v640_v47 }
  0xba   :  { %v506_v49 = vpop.f32.mrf.mxu2 }
  0xbb   :  { %v1007_v50 = vpop.eup %1006  ;;  %v519_v52 = vpop.f32.mrf.mxu3 }
  0xbc   :  { %v530_v48 = vpop.f32.mrf.mxu0  ;;  %v1009_v54 = vpop.eup %1008  ;;  %v618_v55 = vadd.f32 1.0, %v1007_v50 }
  0xbd   :  { %v594_v51 = vmul.f32 0.5, %v530_v48  ;;  %v543_v53 = vpop.f32.mrf.mxu1  ;;  %v619_v57 = vadd.f32 1.0, %v1009_v54 }
  0xbe   :  { %v595_v56 = vmul.f32 0.5, %v543_v53  ;;  %v631_v58 = vmul.f32 0.5, %v618_v55 }
  0xbf   :  { %1010 = vtanh.f32 %v594_v51  ;;  %v632_v59 = vmul.f32 0.5, %v619_v57 }
  0xc0   :  { %1012 = vtanh.f32 %v595_v56 }
  0xc1   :  { %v641_v60 = vpack.c.bf16 %v632_v59, %v631_v58 }
  0xc3   :  { %648 = vst [vmem:[%s1479_s2 + $0x18] sm:$0xff] %v641_v60 }
  0xc4   :  { %v532_v61 = vpop.f32.mrf.mxu0  ;;  %v556_v62 = vpop.f32.mrf.mxu2 }
  0xc5   :  { %v1011_v63 = vpop.eup %1010  ;;  %v596_v0 = vmul.f32 0.5, %v556_v62  ;;  %v569_v1 = vpop.f32.mrf.mxu3 }
  0xc6   :  { %v545_v2 = vpop.f32.mrf.mxu1  ;;  %v1013_v3 = vpop.eup %1012  ;;  %v620_v4 = vadd.f32 1.0, %v1011_v63  ;;  %v597_v5 = vmul.f32 0.5, %v569_v1 }
  0xc7   :  { %v621_v6 = vadd.f32 1.0, %v1013_v3  ;;  %1014 = vtanh.f32 %v596_v0 }
  0xc8   :  { %v633_v7 = vmul.f32 0.5, %v620_v4  ;;  %1016 = vtanh.f32 %v597_v5 }
  0xc9   :  { %v634_v8 = vmul.f32 0.5, %v621_v6 }
  0xcb   :  { %v642_v9 = vpack.c.bf16 %v634_v8, %v633_v7 }
  0xcc   :  { %v558_v11 = vpop.f32.mrf.mxu2 }
  0xcd   :  { %v1015_v12 = vpop.eup %1014  ;;  %649 = vst [vmem:[%s1479_s2 + $0x20] sm:$0xff] %v642_v9  ;;  %v571_v13 = vpop.f32.mrf.mxu3 }
  0xce   :  { %v1017_v15 = vpop.eup %1016  ;;  %v622_v16 = vadd.f32 1.0, %v1015_v12 }
  0xcf   :  { %v623_v18 = vadd.f32 1.0, %v1017_v15 }
  0xd0   :  { %v582_v14 = vpop.f32.mrf.mxu0  ;;  %v635_v19 = vmul.f32 0.5, %v622_v16 }
  0xd1   :  { %v598_v17 = vmul.f32 0.5, %v582_v14  ;;  %v636_v20 = vmul.f32 0.5, %v623_v18 }
  0xd3   :  { %1018 = vtanh.f32 %v598_v17  ;;  %v643_v10 = vpack.c.bf16 %v636_v20, %v635_v19 }
  0xd5   :  { %650 = vst [vmem:[%s1479_s2 + $0x28] sm:$0xff] %v643_v10 }
  0xd8   :  { %v584_v21 = vpop.f32.mrf.mxu0 }
  0xd9   :  { %v1019_v22 = vpop.eup %1018 }
  0xda   :  { %v624_v23 = vadd.f32 1.0, %v1019_v22 }
  0xdc   :  { %v637_v24 = vmul.f32 0.5, %v624_v23 }
  0xde   :  { %v644_v25 = vpack.c.bf16 %v637_v24, %v637_v24 }
  0xe0   :  { %651 = vst [vmem:[%s1479_s2 + $0x30] sm:$0xf] %v644_v25 }

// kernel: lenet5_forward.4
= control target key start
LH: loop header
LB: loop body
LE: loop exit
PB: predicated region body
PF: predicated region fallthrough
CT: control target
= control target key end

     0   :  { %vm143_vm0 = vcmask 261120   ;;  %s500_s0 = inlined_call_operand.vmem [shape: bf16[160,256], index: 0, kind: input, shape index: {}]   ;;  %s501_s1 = inlined_call_operand.vmem [shape: bf16[16,160], index: 1, kind: input, shape index: {}]   ;;  %s502_s2 = inlined_call_operand.vmem [shape: bf16[16,256], index: 2, kind: output, shape index: {}]  }
   0x1   :  { %v293_v0 = vld [vmem:[%s500_s0 + $0x70] sm:$0xf]  ;;  %v334_v1 = vld [vmem:[%s500_s0 + $0x74] sm:$0xf0]  ;;  %v333_v2 = vld [vmem:[%s500_s0 + $0x74] sm:$0xf] }
   0x2   :  { %v294_v3 = vor.u32 %v334_v1, %v293_v0  ;;  %v295_v4 = vld [vmem:[%s500_s0 + $0x78] sm:$0xf0]  ;;  %v285_v5 = vld [vmem:[%s500_s0 + $0x60] sm:$0xf]  ;;  %v332_v6 = vld [vmem:[%s500_s0 + $0x64] sm:$0xf0] }
   0x3   :  { %v298_v7 = vor.u32 %v333_v2, %v295_v4  ;;  %v331_v8 = vld [vmem:[%s500_s0 + $0x64] sm:$0xf]  ;;  %v287_v9 = vld [vmem:[%s500_s0 + $0x68] sm:$0xf0]  ;;  %v286_v10 = vor.u32 %v332_v6, %v285_v5  ;;  %v277_v12 = vld [vmem:[%s500_s0 + $0x50] sm:$0xf] }
   0x4   :  { %147 = vmatpush.bf16.msra.mxu0 %v294_v3  ;;  %v290_v11 = vor.u32 %v331_v8, %v287_v9  ;;  %v330_v13 = vld [vmem:[%s500_s0 + $0x54] sm:$0xf0]  ;;  %v329_v14 = vld [vmem:[%s500_s0 + $0x54] sm:$0xf]  ;;  %v279_v15 = vld [vmem:[%s500_s0 + $0x58] sm:$0xf0] }
   0x5   :  { %175 = vmatpush.bf16.msra.mxu2 %v298_v7  ;;  %v337_v16 = vld [vmem:[%s500_s0 + $0x94] sm:$0xf]  ;;  %v278_v17 = vor.u32 %v330_v13, %v277_v12  ;;  %v269_v18 = vld [vmem:[%s500_s0 + $0x40] sm:$0xf]  ;;  %v328_v19 = vld [vmem:[%s500_s0 + $0x44] sm:$0xf0]  ;;  %v282_v21 = vor.u32 %v329_v14, %v279_v15 }
   0x6   :  { %v311_v20 = vld [vmem:[%s500_s0 + $0x98] sm:$0xf0]  ;;  %v327_v22 = vld [vmem:[%s500_s0 + $0x44] sm:$0xf]  ;;  %v271_v23 = vld [vmem:[%s500_s0 + $0x48] sm:$0xf0]  ;;  %v270_v33 = vor.u32 %v328_v19, %v269_v18 }
   0x7   :  { %v314_v24 = vor.u32 %v337_v16, %v311_v20  ;;  %v335_v25 = vld [vmem:[%s500_s0 + $0x84] sm:$0xf]  ;;  %v303_v26 = vld [vmem:[%s500_s0 + $0x88] sm:$0xf0]  ;;  %v309_v27 = vld [vmem:[%s500_s0 + $0x90] sm:$0xf]  ;;  %v274_v35 = vor.u32 %v327_v22, %v271_v23 }
   0x8   :  { %148 = vmatpush.bf16.msra.mxu0 %v286_v10  ;;  %v338_v28 = vld [vmem:[%s500_s0 + $0x94] sm:$0xf0]  ;;  %v306_v29 = vor.u32 %v335_v25, %v303_v26  ;;  %v317_v31 = vld [vmem:[%s501_s1 + $0x4] sm:$0xf]  ;;  %v231_v32 = vld [vmem:[%s501_s1 + $0x8] sm:$0xf0] }
   0x9   :  { %176 = vmatpush.bf16.msra.mxu2 %v290_v11  ;;  %195 = vmatpush.bf16.msra.mxu3 %v314_v24  ;;  %v310_v30 = vor.u32 %v338_v28, %v309_v27  ;;  %v261_v34 = vld [vmem:[%s500_s0 + $0x30] sm:$0xf]  ;;  %v326_v36 = vld [vmem:[%s500_s0 + $0x34] sm:$0xf0]  ;;  %v301_v37 = vld [vmem:[%s500_s0 + $0x80] sm:$0xf]  ;;  %v234_v41 = vor.u32 %v317_v31, %v231_v32 }
   0xa   :  { %v336_v38 = vld [vmem:[%s500_s0 + $0x84] sm:$0xf0]  ;;  %v325_v39 = vld [vmem:[%s500_s0 + $0x34] sm:$0xf]  ;;  %v263_v40 = vld [vmem:[%s500_s0 + $0x38] sm:$0xf0]  ;;  %v262_v43 = vor.u32 %v326_v36, %v261_v34 }
   0xb   :  { %167 = vmatpush.bf16.msra.mxu1 %v310_v30  ;;  %v302_v42 = vor.u32 %v336_v38, %v301_v37  ;;  %v266_v44 = vor.u32 %v325_v39, %v263_v40  ;;  %v253_v45 = vld [vmem:[%s500_s0 + $0x20] sm:$0xf]  ;;  %v324_v46 = vld [vmem:[%s500_s0 + $0x24] sm:$0xf0]  ;;  %v323_v47 = vld [vmem:[%s500_s0 + $0x24] sm:$0xf] }
   0xc   :  { %149 = vmatpush.bf16.msra.mxu0 %v278_v17  ;;  %v255_v48 = vld [vmem:[%s500_s0 + $0x28] sm:$0xf0]  ;;  %v254_v49 = vor.u32 %v324_v46, %v253_v45  ;;  %v245_v51 = vld [vmem:[%s500_s0 + $0x10] sm:$0xf]  ;;  %v322_v52 = vld [vmem:[%s500_s0 + $0x14] sm:$0xf0] }
   0xd   :  { %177 = vmatpush.bf16.msra.mxu2 %v282_v21  ;;  %196 = vmatpush.bf16.msra.mxu3 %v306_v29  ;;  %v258_v50 = vor.u32 %v323_v47, %v255_v48  ;;  %v321_v53 = vld [vmem:[%s500_s0 + $0x14] sm:$0xf]  ;;  %v247_v54 = vld [vmem:[%s500_s0 + $0x18] sm:$0xf0]  ;;  %v246_v55 = vor.u32 %v322_v52, %v245_v51  ;;  %v237_v57 = vld [vmem:[%s500_s0] sm:$0xf] }
   0xe   :  { %v250_v56 = vor.u32 %v321_v53, %v247_v54  ;;  %v320_v58 = vld [vmem:[%s500_s0 + $0x4] sm:$0xf0]  ;;  %v319_v59 = vld [vmem:[%s500_s0 + $0x4] sm:$0xf]  ;;  %v239_v60 = vld [vmem:[%s500_s0 + $0x8] sm:$0xf0] }
   0xf   :  { %168 = vmatpush.bf16.msra.mxu1 %v302_v42  ;;  %v238_v61 = vor.u32 %v320_v58, %v237_v57  ;;  %v229_v62 = vld [vmem:[%s501_s1] sm:$0xf]  ;;  %v318_v63 = vld [vmem:[%s501_s1 + $0x4] sm:$0xf0]  ;;  %v242_v0 = vor.u32 %v319_v59, %v239_v60 }
  0x10   :  { %150 = vmatpush.bf16.msra.mxu0 %v270_v33  ;;  %316 = vmatmul.msk.bf16.vlgmr.msra.gmra.mxu3 %vm143_vm0, %v234_v41  ;;  %v230_v1 = vor.u32 %v318_v63, %v229_v62 }
  0x11   :  { %178 = vmatpush.bf16.msra.mxu2 %v274_v35 }
  0x12   :  { %315 = vmatmul.msk.bf16.vlgmr.msra.gmra.mxu1 %vm143_vm0, %v234_v41 }
  0x14   :  { %151 = vmatpush.bf16.msra.mxu0 %v262_v43 }
  0x15   :  { %179 = vmatpush.bf16.msra.mxu2 %v266_v44 }
  0x18   :  { %152 = vmatpush.bf16.msra.mxu0 %v254_v49 }
  0x19   :  { %180 = vmatpush.bf16.msra.mxu2 %v258_v50 }
  0x1c   :  { %153 = vmatpush.bf16.msra.mxu0 %v246_v55 }
  0x1d   :  { %181 = vmatpush.bf16.msra.mxu2 %v250_v56 }
  0x20   :  { %154 = vmatpush.bf16.msra.mxu0 %v238_v61 }
  0x21   :  { %182 = vmatpush.bf16.msra.mxu2 %v242_v0 }
  0x23   :  { %155 = vmatmul.bf16.vlgmr.msra.gmra.mxu0 %v230_v1 }
  0x24   :  { %183 = vmatmul.bf16.vlgmr.msra.gmra.mxu2 %v230_v1 }
  0x8f   :  { %v170_v2 = vpop.f32.mrf.mxu1 }
  0x93   :  { %v198_v6 = vpop.f32.mrf.mxu3 }
  0x97   :  { %v172_v8 = vpop.f32.mrf.mxu1 }
  0x9b   :  { %v200_v16 = vpop.f32.mrf.mxu3 }
  0xa0   :  { %v156_v3 = vpop.f32.mrf.mxu0 }
  0xa1   :  { %v171_v4 = vadd.f32 %v170_v2, %v156_v3 }
  0xa3   :  { %v203_v5 = vmul.f32 0.5, %v171_v4 }
  0xa5   :  { %339 = vtanh.f32 %v203_v5 }
  0xa7   :  { %v184_v7 = vpop.f32.mrf.mxu2 }
  0xa8   :  { %v199_v9 = vadd.f32 %v198_v6, %v184_v7  ;;  %v158_v10 = vpop.f32.mrf.mxu0 }
  0xa9   :  { %v173_v11 = vadd.f32 %v172_v8, %v158_v10 }
  0xaa   :  { %v204_v12 = vmul.f32 0.5, %v199_v9 }
  0xab   :  { %v340_v13 = vpop.eup %339  ;;  %v205_v14 = vmul.f32 0.5, %v173_v11 }
  0xac   :  { %341 = vtanh.f32 %v204_v12  ;;  %v211_v15 = vadd.f32 1.0, %v340_v13 }
  0xad   :  { %343 = vtanh.f32 %v205_v14 }
  0xae   :  { %v215_v21 = vmul.f32 0.5, %v211_v15 }
  0xaf   :  { %v186_v17 = vpop.f32.mrf.mxu2 }
  0xb0   :  { %v201_v18 = vadd.f32 %v200_v16, %v186_v17 }
  0xb2   :  { %v342_v19 = vpop.eup %341  ;;  %v206_v20 = vmul.f32 0.5, %v201_v18 }
  0xb3   :  { %v212_v22 = vadd.f32 1.0, %v342_v19  ;;  %v344_v24 = vpop.eup %343 }
  0xb4   :  { %345 = vtanh.f32 %v206_v20  ;;  %v213_v26 = vadd.f32 1.0, %v344_v24 }
  0xb5   :  { %v216_v23 = vmul.f32 0.5, %v212_v22 }
  0xb6   :  { %v217_v29 = vmul.f32 0.5, %v213_v26 }
  0xb7   :  { %v219_v25 = vpack.c.bf16 %v216_v23, %v215_v21 }
  0xb9   :  { %221 = vst [vmem:[%s502_s2] sm:$0xff] %v219_v25 }
  0xba   :  { %v346_v27 = vpop.eup %345 }
  0xbb   :  { %v214_v28 = vadd.f32 1.0, %v346_v27 }
  0xbd   :  { %v218_v30 = vmul.f32 0.5, %v214_v28 }
  0xbf   :  { %v220_v31 = vpack.c.bf16 %v218_v30, %v217_v29 }
  0xc1   :  { %222 = vst [vmem:[%s502_s2 + $0x8] sm:$0xff] %v220_v31 }

// kernel: lenet5_forward.5
= control target key start
LH: loop header
LB: loop body
LE: loop exit
PB: predicated region body
PF: predicated region fallthrough
CT: control target
= control target key end

     0   :  { %vm248_vm0 = vcmask 130048   ;;  %s908_s1 = inlined_call_operand.vmem [shape: bf16[400,128], index: 1, kind: input, shape index: {}]   ;;  %s909_s0 = inlined_call_operand.vmem [shape: bf16[8,400], index: 0, kind: input, shape index: {}]   ;;  %s910_s3 = inlined_call_operand.vmem [shape: bf16[128,128], index: 3, kind: input, shape index: {}]   ;;  %s911_s2 = inlined_call_operand.vmem [shape: f32[1,128], index: 2, kind: input, shape index: {}]   ;;  %s912_s4 = inlined_call_operand.vmem [shape: f32[1,128], index: 4, kind: input, shape index: {}]   ;;  %s913_s5 = inlined_call_operand.vmem [shape: bf16[128,128], index: 5, kind: input, shape index: {}]   ;;  %s914_s6 = inlined_call_operand.vmem [shape: f32[1,128], index: 6, kind: input, shape index: {}]   ;;  %s915_s7 = inlined_call_operand.vmem [shape: f32[8,128], index: 7, kind: output, shape index: {0}]   ;;  %s916_s8 = inlined_call_operand.vmem [shape: f32[8,128], index: 8, kind: output, shape index: {1}]  }
   0x1   :  { %v676_v0 = vld [vmem:[%s908_s1 + $0x38] sm:$0xff]  ;;  %v675_v3 = vld [vmem:[%s908_s1 + $0x30] sm:$0xff]  ;;  %v674_v6 = vld [vmem:[%s908_s1 + $0x28] sm:$0xff] }
   0x2   :  { %v684_v1 = vld [vmem:[%s908_s1 + $0x78] sm:$0xff]  ;;  %252 = vmatpush.bf16.msra.mxu0 %v676_v0  ;;  %v683_v4 = vld [vmem:[%s908_s1 + $0x70] sm:$0xff]  ;;  %v682_v7 = vld [vmem:[%s908_s1 + $0x68] sm:$0xff] }
   0x3   :  { %v692_v2 = vld [vmem:[%s908_s1 + $0xb8] sm:$0xff]  ;;  %265 = vmatpush.bf16.msra.mxu1 %v684_v1  ;;  %v691_v5 = vld [vmem:[%s908_s1 + $0xb0] sm:$0xff]  ;;  %v693_v8 = vld [vmem:[%s908_s1 + $0xc0] sm:$0xff] }
   0x4   :  { %278 = vmatpush.bf16.msra.mxu2 %v692_v2  ;;  %v690_v9 = vld [vmem:[%s908_s1 + $0xa8] sm:$0xff]  ;;  %298 = vmatpush.bf16.msra.mxu3 %v693_v8  ;;  %v701_v12 = vld [vmem:[%s910_s3 + $0x38] sm:$0xff]  ;;  %v673_v13 = vld [vmem:[%s908_s1 + $0x20] sm:$0xff] }
   0x5   :  { %v30_v10 = vld [vmem:[%s909_s0 + $0x8] sm:$0xff]  ;;  %v681_v14 = vld [vmem:[%s908_s1 + $0x60] sm:$0xff]  ;;  %v700_v17 = vld [vmem:[%s910_s3 + $0x30] sm:$0xff] }
   0x6   :  { %253 = vmatpush.bf16.msra.mxu0 %v675_v3  ;;  %v90_v11 = vunpack.c.h.b16 %v30_v10  ;;  %v689_v16 = vld [vmem:[%s908_s1 + $0xa0] sm:$0xff]  ;;  %v672_v18 = vld [vmem:[%s908_s1 + $0x18] sm:$0xff]  ;;  %v699_v21 = vld [vmem:[%s910_s3 + $0x28] sm:$0xff]  ;;  %v89_v35 = vunpack.c.l.b16 %v30_v10 }
   0x7   :  { %266 = vmatpush.bf16.msra.mxu1 %v683_v4  ;;  %v680_v19 = vld [vmem:[%s908_s1 + $0x58] sm:$0xff]  ;;  %v671_v22 = vld [vmem:[%s908_s1 + $0x10] sm:$0xff]  ;;  %v698_v25 = vld [vmem:[%s910_s3 + $0x20] sm:$0xff] }
   0x8   :  { %279 = vmatpush.bf16.msra.mxu2 %v691_v5  ;;  %v94_v15 = vpack.c.b16 %v90_v11, %v90_v11  ;;  %373 = vmatpush.bf16.msrb.mxu3 %v701_v12  ;;  %v688_v20 = vld [vmem:[%s908_s1 + $0x98] sm:$0xff]  ;;  %v679_v23 = vld [vmem:[%s908_s1 + $0x50] sm:$0xff]  ;;  %v670_v26 = vld [vmem:[%s908_s1 + $0x8] sm:$0xff]  ;;  %v93_v39 = vpack.c.b16 %v89_v35, %v89_v35 }
   0x9   :  { %v687_v24 = vld [vmem:[%s908_s1 + $0x90] sm:$0xff]  ;;  %v678_v27 = vld [vmem:[%s908_s1 + $0x48] sm:$0xff]  ;;  %v29_v28 = vld [vmem:[%s909_s0] sm:$0xff] }
   0xa   :  { %254 = vmatpush.bf16.msra.mxu0 %v674_v6  ;;  %604 = vmatmul.msk.bf16.vlgmr.msra.gmra.mxu3 %vm248_vm0, %v94_v15  ;;  %v686_v29 = vld [vmem:[%s908_s1 + $0x88] sm:$0xff]  ;;  %v697_v30 = vld [vmem:[%s910_s3 + $0x18] sm:$0xff]  ;;  %v87_v31 = vunpack.c.l.b16 %v29_v28  ;;  %v88_v32 = vunpack.c.h.b16 %v29_v28  ;;  %v669_v33 = vld [vmem:[%s908_s1] sm:$0xff] }
   0xb   :  { %267 = vmatpush.bf16.msra.mxu1 %v682_v7  ;;  %v677_v34 = vld [vmem:[%s908_s1 + $0x40] sm:$0xff]  ;;  %v696_v40 = vld [vmem:[%s910_s3 + $0x10] sm:$0xff]  ;;  %v695_v41 = vld [vmem:[%s910_s3 + $0x8] sm:$0xff] }
   0xc   :  { %280 = vmatpush.bf16.msra.mxu2 %v690_v9  ;;  %374 = vmatpush.bf16.msrb.mxu3 %v700_v17  ;;  %v685_v36 = vld [vmem:[%s908_s1 + $0x80] sm:$0xff]  ;;  %v91_v37 = vpack.c.b16 %v87_v31, %v87_v31  ;;  %v92_v38 = vpack.c.b16 %v88_v32, %v88_v32  ;;  %v709_v43 = vld [vmem:[%s913_s5 + $0x38] sm:$0xff]  ;;  %v708_v45 = vld [vmem:[%s913_s5 + $0x30] sm:$0xff] }
   0xd   :  { %v694_v42 = vld [vmem:[%s910_s3] sm:$0xff]  ;;  %v707_v46 = vld [vmem:[%s913_s5 + $0x28] sm:$0xff]  ;;  %v705_v61 = vld [vmem:[%s913_s5 + $0x18] sm:$0xff] }
   0xe   :  { %255 = vmatpush.bf16.msra.mxu0 %v673_v13  ;;  %v706_v48 = vld [vmem:[%s913_s5 + $0x20] sm:$0xff]  ;;  %v704_v62 = vld [vmem:[%s913_s5 + $0x10] sm:$0xff]  ;;  %v703_v63 = vld [vmem:[%s913_s5 + $0x8] sm:$0xff] }
   0xf   :  { %268 = vmatpush.bf16.msra.mxu1 %v681_v14  ;;  %v710_v49 = vld [vmem:[%s911_s2] ss:$0 sm:$0xff] }
  0x10   :  { %281 = vmatpush.bf16.msra.mxu2 %v689_v16  ;;  %375 = vmatpush.bf16.msrb.mxu3 %v699_v21  ;;  %v702_v0 = vld [vmem:[%s913_s5] sm:$0xff] }
  0x11   :  { %v711_v1 = vld [vmem:[%s912_s4] ss:$0 sm:$0xff] }
  0x12   :  { %256 = vmatpush.bf16.msra.mxu0 %v672_v18  ;;  %v712_v10 = vld [vmem:[%s914_s6] ss:$0 sm:$0xff] }
  0x13   :  { %269 = vmatpush.bf16.msra.mxu1 %v680_v19 }
  0x14   :  { %282 = vmatpush.bf16.msra.mxu2 %v688_v20  ;;  %376 = vmatpush.bf16.msrb.mxu3 %v698_v25 }
  0x16   :  { %257 = vmatpush.bf16.msra.mxu0 %v671_v22 }
  0x17   :  { %270 = vmatpush.bf16.msra.mxu1 %v679_v23 }
  0x18   :  { %283 = vmatpush.bf16.msra.mxu2 %v687_v24  ;;  %377 = vmatpush.bf16.msrb.mxu3 %v697_v30 }
  0x1a   :  { %258 = vmatpush.bf16.msra.mxu0 %v670_v26 }
  0x1b   :  { %271 = vmatpush.bf16.msra.mxu1 %v678_v27 }
  0x1c   :  { %284 = vmatpush.bf16.msra.mxu2 %v686_v29  ;;  %378 = vmatpush.bf16.msrb.mxu3 %v696_v40 }
  0x1e   :  { %259 = vmatpush.bf16.msra.mxu0 %v669_v33 }
  0x1f   :  { %272 = vmatpush.bf16.msra.mxu1 %v677_v34 }
  0x20   :  { %285 = vmatpush.bf16.msra.mxu2 %v685_v36  ;;  %379 = vmatpush.bf16.msrb.mxu3 %v695_v41 }
  0x21   :  { %260 = vmatmul.bf16.vlgmr.msra.gmra.mxu0 %v91_v37 }
  0x22   :  { %273 = vmatmul.bf16.vlgmr.msra.gmra.mxu1 %v92_v38  ;;  %459 = vmatpush.bf16.msrb.mxu0 %v709_v43 }
  0x23   :  { %286 = vmatmul.bf16.vlgmr.msra.gmra.mxu2 %v93_v39 }
  0x24   :  { %380 = vmatpush.bf16.msrb.mxu3 %v694_v42 }
  0x26   :  { %460 = vmatpush.bf16.msrb.mxu0 %v708_v45 }
  0x2a   :  { %461 = vmatpush.bf16.msrb.mxu0 %v707_v46 }
  0x2e   :  { %462 = vmatpush.bf16.msrb.mxu0 %v706_v48 }
  0x32   :  { %463 = vmatpush.bf16.msrb.mxu0 %v705_v61 }
  0x36   :  { %464 = vmatpush.bf16.msrb.mxu0 %v704_v62 }
  0x3a   :  { %465 = vmatpush.bf16.msrb.mxu0 %v703_v63 }
  0x3e   :  { %466 = vmatpush.bf16.msrb.mxu0 %v702_v0 }
  0x8d   :  { %v300_v44 = vpop.f32.mrf.mxu3 }
  0x95   :  { %v302_v47 = vpop.f32.mrf.mxu3 }
  0x9e   :  { %v261_v50 = vpop.f32.mrf.mxu0 }
  0x9f   :  { %v274_v51 = vpop.f32.mrf.mxu1  ;;  %v262_v52 = vadd.f32 %v710_v49, %v261_v50 }
  0xa1   :  { %v275_v53 = vadd.f32 %v274_v51, %v262_v52 }
  0xa6   :  { %v287_v54 = vpop.f32.mrf.mxu2  ;;  %v263_v56 = vpop.f32.mrf.mxu0 }
  0xa7   :  { %v288_v55 = vadd.f32 %v287_v54, %v275_v53  ;;  %v276_v57 = vpop.f32.mrf.mxu1 }
  0xa9   :  { %v301_v58 = vadd.f32 %v300_v44, %v288_v55 }
  0xab   :  { %v304_v59 = vpack.c.bf16 %v301_v58, %v301_v58 }
  0xad   :  { %381 = vmatmul.bf16.vlgmr.msrb.gmra.mxu3 %v304_v59 }
  0xae   :  { %v289_v60 = vpop.f32.mrf.mxu2 }
 0x130   :  { %v382_v2 = vpop.f32.mrf.mxu3 }
 0x131   :  { %v383_v3 = vadd.f32 %v711_v1, %v382_v2 }
 0x133   :  { %v386_v4 = vmul.f32 0.5, %v383_v3 }
 0x135   :  { %713 = vtanh.f32 %v386_v4 }
 0x138   :  { %v384_v5 = vpop.f32.mrf.mxu3 }
 0x13b   :  { %v714_v6 = vpop.eup %713 }
 0x13c   :  { %v388_v7 = vadd.f32 1.0, %v714_v6 }
 0x13e   :  { %v389_v8 = vmul.f32 0.5, %v388_v7 }
 0x140   :  { %v390_v9 = vpack.c.bf16 %v389_v8, %v389_v8 }
 0x142   :  { %467 = vmatmul.bf16.vlgmr.msrb.gmra.mxu0 %v390_v9 }
 0x1bf   :  { %v468_v11 = vpop.f32.mrf.mxu0 }
 0x1c0   :  { %v469_v12 = vadd.f32 %v712_v10, %v468_v11 }
 0x1c2   :  { %472 = vst [vmem:[%s915_s7] sm:$0xff] %v469_v12  ;;  %473 = vmax.xlane.f32.xlu0 %v469_v12 }
 0x1c7   :  { %v470_v13 = vpop.f32.mrf.mxu0 }
 0x235   :  { %v474_v14 = vpop.xlane.xlu0 %473 }
 0x236   :  { %v475_v15 = vsub.f32 %v469_v12, %v474_v14 }
 0x238   :  { %v476_v16 = vmul.f32 1.442695, %v475_v15 }
 0x23a   :  { %715 = vpow2.f32 %v476_v16 }
 0x240   :  { %v716_v17 = vpop.eup %715 }
 0x241   :  { %478 = vadd.xlane.f32.xlu0 %v716_v17 }
 0x2b4   :  { %v479_v18 = vpop.xlane.xlu0 %478 }
 0x2b5   :  { %717 = vrcp.f32 %v479_v18  ;;  %v491_v22 = vand.u32 2147483648, %v479_v18  ;;  %v489_v24 = vand.u32 2147483647, %v479_v18  ;;  %vm485_vm2 = vweird.f32 %v479_v18 }
 0x2b7   :  { %v492_v26 = vor.u32 1.1754944e-38, %v491_v22  ;;  %vm490_vm4 = vcmp.eq.f32.partialorder %v489_v24, 8.507059e+37 }
 0x2bb   :  { %v718_v19 = vpop.eup %717 }
 0x2bc   :  { %v481_v20 = vmul.f32 %v718_v19, %v479_v18  ;;  %vm486_vm1 = vweird.f32 %v718_v19 }
 0x2bd   :  { %vm487_vm3 = vmor %vm485_vm2, %vm486_vm1 }
 0x2be   :  { %v482_v21 = vsub.f32 1.0, %v481_v20 }
 0x2c0   :  { %v483_v23 = vmul.f32 %v718_v19, %v482_v21 }
 0x2c2   :  { %v484_v25 = vadd.f32 %v718_v19, %v483_v23 }
 0x2c4   :  { %v488_v27 = vsel %vm487_vm3, %v718_v19, %v484_v25 }
 0x2c5   :  { %v493_v28 = vsel %vm490_vm4, %v492_v26, %v488_v27 }
 0x2c6   :  { %v494_v29 = vmul.f32 %v716_v17, %v493_v28 }
 0x2c8   :  { %495 = vst [vmem:[%s916_s8] sm:$0xff] %v494_v29 }

</bundles_post_ra>
